<compile_context>
chip_gen: v7x
topology: tpu7x:2x2x1
jax: 0.10.0
libtpu: 0.0.40
codegen_flags: <defaults>
</compile_context>

<pallas_src>
import jax
import jax.numpy as jnp
from jax.experimental import pallas as pl
from jax.experimental.pallas import tpu as pltpu


# ----------------------------------------------------------------------------
# Zero-copy aliased identity (primary path)
# ----------------------------------------------------------------------------
def _alias_identity_kernel(x_ref, o_ref):
    # The output buffer *is* the input buffer (input_output_aliases={0: 0});
    # nothing needs to move. touch() pins a fake read+write dependency so the
    # aliased output is treated as produced by this kernel.
    pltpu.touch(o_ref)


def _identity_alias(x: jax.Array) -> jax.Array:
    return pl.pallas_call(
        _alias_identity_kernel,
        out_shape=jax.ShapeDtypeStruct(x.shape, x.dtype),
        in_specs=[pl.BlockSpec(memory_space=pl.ANY)],
        out_specs=pl.BlockSpec(memory_space=pl.ANY),
        input_output_aliases={0: 0},
    )(x)


# ----------------------------------------------------------------------------
# Tuned streaming copy (fallback / demonstration path)
# ----------------------------------------------------------------------------
_SUBLANE_PACK = {1: 32, 2: 16, 4: 8}      # itemsize -> sublane packing
_MAX_BLOCK_BYTES = 4 << 20                # 4 MiB blocks: 2 in + 2 out buffers
                                          # = 16 MiB VMEM, safe on v5e/v6e/v7x
_MAX_LANES = 4096                         # wide lane-dense slab (multiple of 128)


def _copy_kernel(x_ref, o_ref):
    # Whole-tile pass-through: lowers to full-width vld/vst, no VALU pressure.
    o_ref[...] = x_ref[...]


def _pick_lanes(total: int) -> int:
    """Largest multiple of 128 that divides `total`, capped at _MAX_LANES."""
    best = 0
    c = 128
    limit = min(total, _MAX_LANES)
    while c <= limit:
        if total % c == 0:
            best = c
        c += 128
    return best


def _identity_copy(x: jax.Array) -> jax.Array:
    total = x.size
    itemsize = jnp.dtype(x.dtype).itemsize
    cols = _pick_lanes(total)

    if cols == 0:
        # Total element count not divisible by 128: copy per-batch with a
        # full-extent trailing block (block dims equal to array dims are
        # always legal). No padding / concatenate.
        blk = (1,) + x.shape[1:]
        ndim = x.ndim
        return pl.pallas_call(
            _copy_kernel,
            out_shape=jax.ShapeDtypeStruct(x.shape, x.dtype),
            grid=(x.shape[0],),
            in_specs=[pl.BlockSpec(blk, lambda i: (i,) + (0,) * (ndim - 1))],
            out_specs=pl.BlockSpec(blk, lambda i: (i,) + (0,) * (ndim - 1)),
            compiler_params=pltpu.CompilerParams(
                dimension_semantics=("parallel",),
            ),
        )(x)

    rows = total // cols
    pack = _SUBLANE_PACK.get(itemsize, 8)
    # Largest row count (multiple of the dtype sublane packing) that keeps a
    # block at <= 4 MiB.
    cap = max(pack, (_MAX_BLOCK_BYTES // (cols * itemsize)) // pack * pack)
    # Either the full row extent (always legal) or a multiple of `pack`.
    tile_rows = rows if rows <= cap else cap

    # Row-major metadata reshape only — no extra HBM pass, no padding.
    x2d = x.reshape(rows, cols)
    out2d = pl.pallas_call(
        _copy_kernel,
        out_shape=jax.ShapeDtypeStruct((rows, cols), x.dtype),
        grid=(pl.cdiv(rows, tile_rows),),
        in_specs=[pl.BlockSpec((tile_rows, cols), lambda i: (i, 0))],
        out_specs=pl.BlockSpec((tile_rows, cols), lambda i: (i, 0)),
        compiler_params=pltpu.CompilerParams(
            dimension_semantics=("parallel",),   # shards across TCs on v7x
            vmem_limit_bytes=48 << 20,           # headroom over the 16 MiB
                                                 # default scoped limit on v5e
        ),
    )(x2d)
    return out2d.reshape(x.shape)


# ----------------------------------------------------------------------------
# Model wrapper
# ----------------------------------------------------------------------------
class MyModelPallas:
    """Pallas equivalent of MyModel: forward(x) -> x.

    `num_classes` is accepted for interface parity; the reference module never
    constructs any parameters, so there is nothing to initialize.
    """

    def __init__(self, num_classes: int, zero_copy: bool = True):
        self.num_classes = num_classes
        self.zero_copy = zero_copy
        # TODO(synk): the reference module declares no architecture; output
        # dimension is therefore whatever shape x already has (identity).

    def __call__(self, x: jax.Array) -> jax.Array:
        if self.zero_copy:
            try:
                # Zero-bytes-moved identity: output aliases the input buffer.
                y = _identity_alias(x)
                # Compile + execute eagerly here so any lowering/runtime issue
                # on this path degrades gracefully to the streaming copy.
                jax.block_until_ready(y)
                return y
            except Exception:
                pass
        return _identity_copy(x)


if __name__ == "__main__":
    key = jax.random.PRNGKey(0)
    # Small NCHW input consistent with an image model: batch=2, channels=4,
    # spatial=16x16.
    x = jax.random.normal(key, (2, 4, 16, 16), dtype=jnp.float32)

    model = MyModelPallas(num_classes=10)

    # Primary (zero-copy aliased) path.
    y = jax.block_until_ready(model(x))
    assert y.shape == x.shape and y.dtype == x.dtype
    assert bool(jnp.array_equal(y, x))

    # Also exercise the tuned lane-dense streaming-copy kernel explicitly.
    y2 = jax.block_until_ready(_identity_copy(x))
    assert y2.shape == x.shape and y2.dtype == x.dtype
    assert bool(jnp.array_equal(y2, x))

    print("KERNEL_OK")
</pallas_src>

<mosaic_0001>
module attributes {stable_mosaic.version = 11 : i64} {
  func.func @_alias_identity_kernel(%arg0: memref<2x4x16x16xf32, #tpu.memory_space<any>>, %arg1: memref<2x4x16x16xf32, #tpu.memory_space<any>>) attributes {dimension_semantics = [], scalar_prefetch = 0 : i64, scratch_operands = 0 : i64, tpu.core_type = #tpu.core_type<tc>} {
    return
  }
}

module attributes {stable_mosaic.version = 11 : i64} {
  func.func @_copy_kernel(%arg0: i32, %arg1: memref<1x2048xf32, #tpu.memory_space<vmem>>, %arg2: memref<1x2048xf32, #tpu.memory_space<vmem>>) attributes {dimension_semantics = [#tpu.dimension_semantics<parallel>], iteration_bounds = array<i64: 1>, scalar_prefetch = 0 : i64, scratch_operands = 0 : i64, tpu.core_type = #tpu.core_type<tc>, window_params = [{transform_indices = @transform_0, window_bounds = array<i64: 1, 2048>}, {transform_indices = @transform_1, window_bounds = array<i64: 1, 2048>}]} {
    %c0 = arith.constant 0 : index
    %c0_0 = arith.constant 0 : index
    %0 = vector.load %arg1[%c0, %c0_0] : memref<1x2048xf32, #tpu.memory_space<vmem>>, vector<1x2048xf32>
    %c0_1 = arith.constant 0 : index
    %c0_2 = arith.constant 0 : index
    %1 = vector.load %arg2[%c0_1, %c0_2] : memref<1x2048xf32, #tpu.memory_space<vmem>>, vector<1x2048xf32>
    tpu.vector_store %arg2[%c0_1, %c0_2], %0 {strides = array<i32>} : memref<1x2048xf32, #tpu.memory_space<vmem>>, vector<1x2048xf32>,
    return
  }
  func.func @transform_0(%arg0: i32) -> (i32, i32) {
    %c0_i32 = arith.constant 0 : i32
    %c0_i32_0 = arith.constant 0 : i32
    return %arg0, %c0_i32 : i32, i32
  }
  func.func @transform_1(%arg0: i32) -> (i32, i32) {
    %c0_i32 = arith.constant 0 : i32
    %c0_i32_0 = arith.constant 0 : i32
    return %arg0, %c0_i32 : i32, i32
  }
}

</mosaic_0001>

<bundles_post_ra>
// kernel: tpu_custom_call.1
= control target key start
LH: loop header
LB: loop body
LE: loop exit
PB: predicated region body
PF: predicated region fallthrough
CT: control target
= control target key end

     0   :  { %s16_s0 = inlined_call_operand.hbm [shape: f32[2,4,16,16], index: 0, kind: input, shape index: {}, may-alias: {0,1}]   ;;  %s17_s1 = inlined_call_operand.hbm [shape: f32[2,4,16,16], index: 1, kind: output, shape index: {}, may-alias: {0,1}]  }

// kernel: tpu_custom_call.1
= control target key start
LH: loop header
LB: loop body
LE: loop exit
PB: predicated region body
PF: predicated region fallthrough
CT: control target
= control target key end

     0   :  { %6 = vsyncpa [#allocation3], 0  ;;  %s126_s0 = inlined_call_operand.hbm [shape: f32[1,2048], index: 0, kind: input, shape index: {}]   ;;  %s127_s1 = inlined_call_operand.hbm [shape: f32[1,2048], index: 1, kind: output, shape index: {}]  }
   0x1   :  { %7 = vsyncpa [#allocation4], 0  ;;  %s90_s6 = smov [#allocation2]   ;;  %s42_s10 = scalar_lea.hbm %s126_s0, 256 }
   0x2   :  { %s14_s7 = sshll.u32 %s90_s6, 4  ;;  %p43_p0 = scmp.ne.s32.totalorder %s126_s0, %s42_s10  ;;  %s15_s7 = int_to_ptr.vmem [resolvable:$true] %s14_s7 }
   0x3   :  { %p46_p1 = scmp.lt.u32.totalorder %s42_s10, %s126_s0 }
   0x5   :  { %p48_p2 = pnand %p46_p1, %p43_p0 }
   0x7   :  { %51 = shalt.err (!%p48_p2)
}
   0x8   :  { %s52_s15 = scalar_lea.vmem %s15_s7, 256  ;;  %p57_p4 = scmp.lt.s32.totalorder %s15_s7, %s15_s7 }
   0x9   :  { %p53_p3 = scmp.ne.s32.totalorder %s15_s7, %s52_s15  ;;  %p58_p5 = scmp.lt.s32.totalorder %s52_s15, %s52_s15 }
   0xb   :  { %p59_p6 = por %p58_p5, %p57_p4 }
   0xd   :  { %p60_p7 = pnand %p59_p6, %p53_p3 }
   0xf   :  { %63 = shalt.err (!%p60_p7)
}
  0x10   :  { %17 = dma.hbm_to_vmem [thread:$0]  %s126_s0, 256, %s15_s7, [#allocation3]  }
  0x11   :  { %86 = dma.done.wait [#allocation3], 256  }
  0x12   :  { %87 = vsyncadd [#allocation3], 4294967040  ;;  %s91_s18 = smov [#allocation5]   ;;  %v21_v0 = vld [vmem:[#allocation2] sm:$0xff]  ;;  %v22_v1 = vld [vmem:[#allocation2 + $0x8] sm:$0xff] }
  0x13   :  { %s31_s19 = sshll.u32 %s91_s18, 4  ;;  %23 = vst [vmem:[#allocation5] sm:$0xff] %v21_v0  ;;  %24 = vst [vmem:[#allocation5 + $0x8] sm:$0xff] %v22_v1  ;;  %s32_s19 = int_to_ptr.vmem [resolvable:$true] %s31_s19 }
  0x14   :  { %s64_s20 = scalar_lea.vmem %s32_s19, 256  ;;  %p69_p9 = scmp.lt.s32.totalorder %s32_s19, %s32_s19 }
  0x15   :  { %p65_p8 = scmp.ne.s32.totalorder %s32_s19, %s64_s20  ;;  %p70_p10 = scmp.lt.s32.totalorder %s64_s20, %s64_s20 }
  0x17   :  { %p71_p11 = por %p70_p10, %p69_p9 }
  0x19   :  { %p72_p12 = pnand %p71_p11, %p65_p8 }
  0x1b   :  { %75 = shalt.err (!%p72_p12)
}
  0x1c   :  { %s76_s0 = scalar_lea.hbm %s127_s1, 256 }
  0x1d   :  { %p77_p13 = scmp.ne.s32.totalorder %s127_s1, %s76_s0  ;;  %p80_p0 = scmp.lt.u32.totalorder %s76_s0, %s127_s1 }
  0x1f   :  { %p82_p1 = pnand %p80_p0, %p77_p13 }
  0x21   :  { %85 = shalt.err (!%p82_p1)
}
  0x22   :  { %34 = dma.vmem_to_hbm [thread:$0]  %s32_s19, 256, %s127_s1, [#allocation4]  }
  0x23   :  { %88 = dma.done.wait [#allocation4], 256  }
  0x24   :  { %89 = vsyncadd [#allocation4], 4294967040 }
  0x25   :  { %38 = vsyncpa [#allocation3], 1 }
  0x26   :  { %39 = vsyncpa [#allocation4], 1 }

</bundles_post_ra>
